<compile_context>
chip_gen: v7x
topology: tpu7x:2x2x1
jax: 0.10.0
libtpu: 0.0.40
codegen_flags: <defaults>
</compile_context>

<pallas_src>
import functools

import numpy as np
import jax
import jax.numpy as jnp
from jax.experimental import pallas as pl
from jax.experimental.pallas import tpu as pltpu

ACT_DTYPE = jnp.bfloat16   # activations / weights in HBM; accumulation in f32


# ----------------------------------------------------------------------------
# small helpers
# ----------------------------------------------------------------------------

def _pick_div(n, cands):
    for c in cands:
        if n % c == 0:
            return c
    return n


def _pick_th(ho, wo):
    """Output-row tile for the direct 3x3 conv (target ~256 output positions)."""
    target = max(1, 256 // max(wo, 1))
    for th in range(min(ho, target), 0, -1):
        if ho % th == 0 and ((th * wo) % 8 == 0 or th == ho):
            return th
    return ho


# ----------------------------------------------------------------------------
# fused matmul kernel:  out = relu?( (A @ B) * scale + shift (+ res) )
# used for all 1x1 convs and for the few strided k x k convs (glue im2col).
# ----------------------------------------------------------------------------

def _mm_kernel(a_ref, b_ref, s_ref, t_ref, *rest, relu, has_res):
    if has_res:
        res_ref, o_ref = rest
    else:
        (o_ref,) = rest
    acc = jnp.dot(a_ref[...], b_ref[...], preferred_element_type=jnp.float32)
    y = acc * s_ref[...] + t_ref[...]
    if has_res:
        y = y + res_ref[...].astype(jnp.float32)
    if relu:
        y = jnp.maximum(y, 0.0)
    o_ref[...] = y.astype(o_ref.dtype)


def fused_matmul(a, b, scale=None, shift=None, res=None, relu=False,
                 out_dtype=ACT_DTYPE):
    M, K = a.shape
    K2, N = b.shape
    assert K == K2
    tm = _pick_div(M, (512, 256, 128, 64, 32, 16, 8))
    tn = _pick_div(N, (256, 128))
    if scale is None:
        scale = jnp.ones((N,), jnp.float32)
    if shift is None:
        shift = jnp.zeros((N,), jnp.float32)
    scale = scale.reshape(1, N).astype(jnp.float32)
    shift = shift.reshape(1, N).astype(jnp.float32)
    a = a.astype(ACT_DTYPE)
    b = b.astype(ACT_DTYPE)

    in_specs = [pl.BlockSpec((tm, K), lambda i, j: (i, 0)),
                pl.BlockSpec((K, tn), lambda i, j: (0, j)),
                pl.BlockSpec((1, tn), lambda i, j: (0, j)),
                pl.BlockSpec((1, tn), lambda i, j: (0, j))]
    args = [a, b, scale, shift]
    if res is not None:
        in_specs.append(pl.BlockSpec((tm, tn), lambda i, j: (i, j)))
        args.append(res.astype(ACT_DTYPE))

    return pl.pallas_call(
        functools.partial(_mm_kernel, relu=relu, has_res=res is not None),
        out_shape=jax.ShapeDtypeStruct((M, N), out_dtype),
        grid=(M // tm, N // tn),
        in_specs=in_specs,
        out_specs=pl.BlockSpec((tm, tn), lambda i, j: (i, j)),
        compiler_params=pltpu.CompilerParams(
            dimension_semantics=("parallel", "parallel")),
    )(*args)


# ----------------------------------------------------------------------------
# direct 3x3 stride-1 conv kernel (no HBM im2col).
# Padded input stays in HBM (memory_space=ANY); each grid step manually DMAs
# an overlapping (th + 2)-row window into VMEM and accumulates the 9 taps.
# Epilogue (BN scale/shift, residual add, ReLU) is fused.
# ----------------------------------------------------------------------------

def _conv3x3_kernel(xp_hbm, w_ref, s_ref, t_ref, *rest,
                    th, wo, relu, has_res, hp):
    if has_res:
        res_ref, o_ref, xbuf, sem = rest
    else:
        o_ref, xbuf, sem = rest
    n = pl.program_id(0)
    i = pl.program_id(1)
    row0 = n * hp + i * th
    cp = pltpu.make_async_copy(xp_hbm.at[pl.ds(row0, th + 2)], xbuf, sem.at[0])
    cp.start()
    cp.wait()

    cout = o_ref.shape[-1]
    acc = jnp.zeros((th * wo, cout), jnp.float32)
    for dy in range(3):
        rows = xbuf[dy:dy + th]                                  # (th, Wp, C)
        taps = [rows[:, dx:dx + wo, :] for dx in range(3)]       # 3 x (th, wo, C)
        a = jnp.concatenate(taps, axis=-1).reshape(th * wo, -1)  # (th*wo, 3C)
        acc = acc + jnp.dot(a, w_ref[dy], preferred_element_type=jnp.float32)

    y = acc * s_ref[...] + t_ref[...]
    if has_res:
        y = y + res_ref[0].astype(jnp.float32)
    if relu:
        y = jnp.maximum(y, 0.0)
    o_ref[0] = y.astype(o_ref.dtype)


def conv3x3_s1(x, w, scale=None, shift=None, res=None, relu=False,
               out_dtype=ACT_DTYPE):
    """x: (N, H, W, Cin) NHWC.  w: (3, 3, Cin, Cout).  stride 1, padding 1."""
    N, H, W, Cin = x.shape
    Cout = w.shape[-1]
    Ho, Wo = H, W
    Hp, Wp = H + 2, W + 2
    xp = jnp.pad(x.astype(ACT_DTYPE), ((0, 0), (1, 1), (1, 1), (0, 0)))
    xp_flat = xp.reshape(N * Hp, Wp, Cin)
    wmat = w.astype(ACT_DTYPE).reshape(3, 3 * Cin, Cout)

    if scale is None:
        scale = jnp.ones((Cout,), jnp.float32)
    if shift is None:
        shift = jnp.zeros((Cout,), jnp.float32)
    scale = scale.reshape(1, Cout).astype(jnp.float32)
    shift = shift.reshape(1, Cout).astype(jnp.float32)

    th = _pick_th(Ho, Wo)
    n_tiles = Ho // th
    has_res = res is not None

    in_specs = [pl.BlockSpec(memory_space=pl.ANY),
                pl.BlockSpec((3, 3 * Cin, Cout), lambda n, i: (0, 0, 0)),
                pl.BlockSpec((1, Cout), lambda n, i: (0, 0)),
                pl.BlockSpec((1, Cout), lambda n, i: (0, 0))]
    args = [xp_flat, wmat, scale, shift]
    if has_res:
        in_specs.append(pl.BlockSpec((1, th * Wo, Cout), lambda n, i: (n, i, 0)))
        args.append(res.reshape(N, Ho * Wo, Cout).astype(ACT_DTYPE))

    out = pl.pallas_call(
        functools.partial(_conv3x3_kernel, th=th, wo=Wo, relu=relu,
                          has_res=has_res, hp=Hp),
        out_shape=jax.ShapeDtypeStruct((N, Ho * Wo, Cout), out_dtype),
        grid_spec=pltpu.PrefetchScalarGridSpec(
            num_scalar_prefetch=0,
            grid=(N, n_tiles),
            in_specs=in_specs,
            out_specs=pl.BlockSpec((1, th * Wo, Cout), lambda n, i: (n, i, 0)),
            scratch_shapes=[pltpu.VMEM((th + 2, Wp, Cin), ACT_DTYPE),
                            pltpu.SemaphoreType.DMA((1,))]),
        compiler_params=pltpu.CompilerParams(
            dimension_semantics=("parallel", "arbitrary")),
    )(*args)
    return out.reshape(N, Ho, Wo, Cout)


# ----------------------------------------------------------------------------
# conv wrappers built on the fused matmul (1x1 convs and the few strided convs)
# ----------------------------------------------------------------------------

def conv1x1(x, w, scale=None, shift=None, res=None, relu=False, stride=1,
            out_dtype=ACT_DTYPE):
    """x NHWC, w (Cin, Cout); epilogue fused into the matmul."""
    if stride != 1:
        x = x[:, ::stride, ::stride, :]
    N, H, W, Cin = x.shape
    Cout = w.shape[-1]
    a = x.reshape(N * H * W, Cin)
    res_flat = None if res is None else res.reshape(N * H * W, Cout)
    y = fused_matmul(a, w.reshape(Cin, Cout), scale=scale, shift=shift,
                     res=res_flat, relu=relu, out_dtype=out_dtype)
    return y.reshape(N, H, W, Cout)


def conv_im2col(x, w, stride, padding, scale=None, shift=None, res=None,
                relu=False, out_dtype=ACT_DTYPE):
    """General k x k conv used only for the few strided convs (stem, layer
    transitions) -- patches gathered in glue, matmul + epilogue in Pallas."""
    N, H, W, Cin = x.shape
    kh, kw, _, Cout = w.shape
    xp = jnp.pad(x.astype(ACT_DTYPE),
                 ((0, 0), (padding, padding), (padding, padding), (0, 0)))
    Ho = (H + 2 * padding - kh) // stride + 1
    Wo = (W + 2 * padding - kw) // stride + 1
    cols = []
    for dy in range(kh):
        for dx in range(kw):
            sl = xp[:, dy:dy + (Ho - 1) * stride + 1:stride,
                    dx:dx + (Wo - 1) * stride + 1:stride, :]
            cols.append(sl)
    a = jnp.concatenate(cols, axis=-1).reshape(N * Ho * Wo, kh * kw * Cin)
    res_flat = None if res is None else res.reshape(N * Ho * Wo, Cout)
    y = fused_matmul(a, w.reshape(kh * kw * Cin, Cout), scale=scale,
                     shift=shift, res=res_flat, relu=relu, out_dtype=out_dtype)
    return y.reshape(N, Ho, Wo, Cout)


# ----------------------------------------------------------------------------
# maxpool 3x3 / stride 2 / pad 1  -- padded input read via row-shifted refs,
# 9-way max reduced inside the kernel (no 9x stacked tensor in HBM).
# ----------------------------------------------------------------------------

def _maxpool_kernel(e0, e1, e2, o0, o1, o2, out_ref, *, wo):
    re = jnp.maximum(jnp.maximum(e0[0], e1[0]), e2[0])   # (wo+1, C)
    ro = jnp.maximum(jnp.maximum(o0[0], o1[0]), o2[0])   # (wo, C)
    m = jnp.maximum(jnp.maximum(re[0:wo], ro[0:wo]), re[1:wo + 1])
    out_ref[0] = m


def maxpool_3x3_s2_p1(x):
    N, H, W, C = x.shape
    Ho = (H - 1) // 2 + 1
    Wo = (W - 1) // 2 + 1
    Hp = H + 2
    xp = jnp.pad(x, ((0, 0), (1, 1), (1, 1), (0, 0)),
                 constant_values=float('-inf'))
    xe = xp[:, :, 0::2, :][:, :, :Wo + 1, :].reshape(N * Hp, Wo + 1, C)
    xo = xp[:, :, 1::2, :][:, :, :Wo, :].reshape(N * Hp, Wo, C)

    in_specs, args = [], []
    for dy in range(3):
        in_specs.append(pl.BlockSpec(
            (1, Wo + 1, C), lambda n, h, dy=dy, Hp=Hp: (n * Hp + 2 * h + dy, 0, 0)))
        args.append(xe)
    for dy in range(3):
        in_specs.append(pl.BlockSpec(
            (1, Wo, C), lambda n, h, dy=dy, Hp=Hp: (n * Hp + 2 * h + dy, 0, 0)))
        args.append(xo)

    out = pl.pallas_call(
        functools.partial(_maxpool_kernel, wo=Wo),
        out_shape=jax.ShapeDtypeStruct((N * Ho, Wo, C), x.dtype),
        grid=(N, Ho),
        in_specs=in_specs,
        out_specs=pl.BlockSpec((1, Wo, C),
                               lambda n, h, Ho=Ho: (n * Ho + h, 0, 0)),
        compiler_params=pltpu.CompilerParams(
            dimension_semantics=("parallel", "arbitrary")),
    )(*args)
    return out.reshape(N, Ho, Wo, C)


# ----------------------------------------------------------------------------
# GroupNorm(32) + ReLU  -- lane-dense (HW, C) blocks; per-group stats obtained
# by per-channel reductions followed by a tiny group-averaging matmul.
# ----------------------------------------------------------------------------

def _gn_relu_kernel(x_ref, gmat_ref, g_ref, b_ref, o_ref, *, eps):
    x = x_ref[0].astype(jnp.float32)                       # (HW, C)
    hw = x.shape[0]
    s1 = jnp.sum(x, axis=0, keepdims=True) * (1.0 / hw)    # per-channel mean
    s2 = jnp.sum(x * x, axis=0, keepdims=True) * (1.0 / hw)
    gm = jnp.dot(s1, gmat_ref[...], preferred_element_type=jnp.float32)
    gm2 = jnp.dot(s2, gmat_ref[...], preferred_element_type=jnp.float32)
    var = gm2 - gm * gm
    inv = jax.lax.rsqrt(var + eps)
    y = (x - gm) * inv * g_ref[...] + b_ref[...]
    o_ref[0] = jnp.maximum(y, 0.0).astype(o_ref.dtype)


def group_norm_relu(x, gamma, beta, groups=32, eps=1e-5):
    N, H, W, C = x.shape
    cg = C // groups
    gmat = jnp.asarray(
        np.kron(np.eye(groups, dtype=np.float32),
                np.ones((cg, cg), np.float32)) / cg)
    x3 = x.reshape(N, H * W, C)
    out = pl.pallas_call(
        functools.partial(_gn_relu_kernel, eps=eps),
        out_shape=jax.ShapeDtypeStruct((N, H * W, C), x.dtype),
        grid=(N,),
        in_specs=[pl.BlockSpec((1, H * W, C), lambda n: (n, 0, 0)),
                  pl.BlockSpec((C, C), lambda n: (0, 0)),
                  pl.BlockSpec((1, C), lambda n: (0, 0)),
                  pl.BlockSpec((1, C), lambda n: (0, 0))],
        out_specs=pl.BlockSpec((1, H * W, C), lambda n: (n, 0, 0)),
        compiler_params=pltpu.CompilerParams(dimension_semantics=("parallel",)),
    )(x3, gmat, gamma.reshape(1, C).astype(jnp.float32),
      beta.reshape(1, C).astype(jnp.float32))
    return out.reshape(N, H, W, C)


# ----------------------------------------------------------------------------
# bilinear upsample (align_corners=True) -- separable: static-index gather in
# glue + Pallas lerp kernel (lane-dense; optional fused sigmoid).
# ----------------------------------------------------------------------------

def _lerp_kernel(lo_ref, hi_ref, w_ref, o_ref, *, sigmoid):
    lo = lo_ref[...].astype(jnp.float32)
    hi = hi_ref[...].astype(jnp.float32)
    y = lo + (hi - lo) * w_ref[...]
    if sigmoid:
        y = 1.0 / (1.0 + jnp.exp(-y))
    o_ref[...] = y.astype(o_ref.dtype)


def _interp_indices(n_in, n_out):
    if n_in == 1:
        z = np.zeros((n_out,), np.int32)
        return z, z, np.zeros((n_out,), np.float32)
    src = np.arange(n_out, dtype=np.float64) * (n_in - 1) / max(n_out - 1, 1)
    lo = np.minimum(np.floor(src).astype(np.int64), n_in - 2)
    wt = (src - lo).astype(np.float32)
    return lo.astype(np.int32), (lo + 1).astype(np.int32), wt


def _bilinear_axis(x, axis, n_out, sigmoid=False, out_dtype=None):
    N, H, W, C = x.shape
    n_in = x.shape[axis]
    lo, hi, wt = _interp_indices(n_in, n_out)
    x_lo = jnp.take(x, jnp.asarray(lo), axis=axis)
    x_hi = jnp.take(x, jnp.asarray(hi), axis=axis)
    if axis == 1:
        rows, lanes = N * n_out, W * C
        wvec = jnp.asarray(np.tile(wt, N).reshape(rows, 1))
    else:
        rows, lanes = N * H, n_out * C
        wvec = jnp.asarray(np.repeat(wt, C).reshape(1, lanes))
    xl = x_lo.reshape(rows, lanes)
    xh = x_hi.reshape(rows, lanes)
    tr = _pick_div(rows, (512, 256, 128, 64, 32, 16, 8))
    if axis == 1:
        w_spec = pl.BlockSpec((tr, 1), lambda i: (i, 0))
    else:
        w_spec = pl.BlockSpec((1, lanes), lambda i: (0, 0))
    out_dtype = out_dtype or x.dtype
    out = pl.pallas_call(
        functools.partial(_lerp_kernel, sigmoid=sigmoid),
        out_shape=jax.ShapeDtypeStruct((rows, lanes), out_dtype),
        grid=(rows // tr,),
        in_specs=[pl.BlockSpec((tr, lanes), lambda i: (i, 0)),
                  pl.BlockSpec((tr, lanes), lambda i: (i, 0)),
                  w_spec],
        out_specs=pl.BlockSpec((tr, lanes), lambda i: (i, 0)),
        compiler_params=pltpu.CompilerParams(dimension_semantics=("parallel",)),
    )(xl, xh, wvec)
    if axis == 1:
        return out.reshape(N, n_out, W, C)
    return out.reshape(N, H, n_out, C)


def bilinear_x2(x):
    x = _bilinear_axis(x, 1, x.shape[1] * 2)
    return _bilinear_axis(x, 2, x.shape[2] * 2)


def bilinear_x4_sigmoid(x):
    x = _bilinear_axis(x, 1, x.shape[1] * 4)
    return _bilinear_axis(x, 2, x.shape[2] * 4, sigmoid=True,
                          out_dtype=jnp.float32)


# ----------------------------------------------------------------------------
# 4-way merge sum (MergeBlock 'add')
# ----------------------------------------------------------------------------

def _sum4_kernel(a, b, c, d, o):
    o[...] = (a[...].astype(jnp.float32) + b[...].astype(jnp.float32) +
              c[...].astype(jnp.float32) + d[...].astype(jnp.float32)
              ).astype(o.dtype)


def merge_sum4(xs):
    N, H, W, C = xs[0].shape
    rows = N * H * W
    flat = [x.reshape(rows, C) for x in xs]
    tr = _pick_div(rows, (1024, 512, 256, 128, 64, 32, 16, 8))
    out = pl.pallas_call(
        _sum4_kernel,
        out_shape=jax.ShapeDtypeStruct((rows, C), xs[0].dtype),
        grid=(rows // tr,),
        in_specs=[pl.BlockSpec((tr, C), lambda i: (i, 0))] * 4,
        out_specs=pl.BlockSpec((tr, C), lambda i: (i, 0)),
        compiler_params=pltpu.CompilerParams(dimension_semantics=("parallel",)),
    )(*flat)
    return out.reshape(N, H, W, C)


# ----------------------------------------------------------------------------
# parameter init (deterministic, synthetic -- resnet18 encoder configuration)
# weights are stored HWIO: (kh, kw, Cin, Cout); 1x1 weights as (Cin, Cout).
# ----------------------------------------------------------------------------

class _PRNG:
    def __init__(self, key):
        self.key = key

    def next(self):
        self.key, sub = jax.random.split(self.key)
        return sub


def _conv_w(rng, kh, kw, cin, cout):
    fan_in = cin * kh * kw
    return (jax.random.normal(rng.next(), (kh, kw, cin, cout), jnp.float32)
            / np.sqrt(fan_in))


def _bn_scale_shift(c):
    # inference-mode BatchNorm with gamma=1, beta=0, running_mean=0, running_var=1
    return (jnp.full((c,), 1.0 / np.sqrt(1.0 + 1e-5), jnp.float32),
            jnp.zeros((c,), jnp.float32))


def init_fpn_params(key):
    rng = _PRNG(key)
    P = {}
    P['conv1_w'] = _conv_w(rng, 7, 7, 3, 64)
    P['bn1'] = _bn_scale_shift(64)

    def basic_block(cin, cout, stride):
        blk = {'stride': stride,
               'conv1_w': _conv_w(rng, 3, 3, cin, cout),
               'bn1': _bn_scale_shift(cout),
               'conv2_w': _conv_w(rng, 3, 3, cout, cout),
               'bn2': _bn_scale_shift(cout)}
        if stride != 1 or cin != cout:
            blk['down_w'] = _conv_w(rng, 1, 1, cin, cout).reshape(cin, cout)
            blk['down_bn'] = _bn_scale_shift(cout)
        return blk

    layer_cfg = [(64, 64, 1, 2), (64, 128, 2, 2), (128, 256, 2, 2),
                 (256, 512, 2, 2)]
    P['layers'] = []
    for cin, cout, stride, nblk in layer_cfg:
        blocks = [basic_block(cin, cout, stride)]
        for _ in range(nblk - 1):
            blocks.append(basic_block(cout, cout, 1))
        P['layers'].append(blocks)

    def lateral(cin):
        return (_conv_w(rng, 1, 1, cin, 256).reshape(cin, 256),
                jnp.zeros((256,), jnp.float32))
    P['p5_w'], P['p5_b'] = lateral(512)
    P['p4_w'], P['p4_b'] = lateral(256)
    P['p3_w'], P['p3_b'] = lateral(128)
    P['p2_w'], P['p2_b'] = lateral(64)

    seg = []
    for n_up in [3, 2, 1, 0]:
        blocks = []
        cin = 256
        for i in range(max(n_up, 1)):
            blocks.append({'w': _conv_w(rng, 3, 3, cin, 128),
                           'gamma': jnp.ones((128,), jnp.float32),
                           'beta': jnp.zeros((128,), jnp.float32),
                           'upsample': bool(n_up) if i == 0 else True})
            cin = 128
        seg.append(blocks)
    P['seg'] = seg

    P['out_w'] = _conv_w(rng, 1, 1, 128, 1).reshape(128, 1)
    P['out_b'] = jnp.zeros((1,), jnp.float32)
    return P


# ----------------------------------------------------------------------------
# forward pass (all internal tensors NHWC, bf16)
# ----------------------------------------------------------------------------

def _basic_block_forward(x, blk):
    s = blk['stride']
    if 'down_w' in blk:
        identity = conv1x1(x, blk['down_w'], scale=blk['down_bn'][0],
                           shift=blk['down_bn'][1], stride=s)
    else:
        identity = x
    if s == 1:
        out = conv3x3_s1(x, blk['conv1_w'], scale=blk['bn1'][0],
                         shift=blk['bn1'][1], relu=True)
    else:
        out = conv_im2col(x, blk['conv1_w'], stride=s, padding=1,
                          scale=blk['bn1'][0], shift=blk['bn1'][1], relu=True)
    # conv2 is always 3x3 stride 1: BN2 + residual add + ReLU fused in epilogue
    return conv3x3_s1(out, blk['conv2_w'], scale=blk['bn2'][0],
                      shift=blk['bn2'][1], res=identity, relu=True)


def _encoder_forward(x, P):
    feats = [x]                                             # stage 0: identity
    y = conv_im2col(x, P['conv1_w'], stride=2, padding=3,
                    scale=P['bn1'][0], shift=P['bn1'][1], relu=True)
    feats.append(y)                                         # stage 1
    y = maxpool_3x3_s2_p1(y)
    for blk in P['layers'][0]:
        y = _basic_block_forward(y, blk)
    feats.append(y)                                         # stage 2
    for li in range(1, 4):                                  # stages 3-5
        for blk in P['layers'][li]:
            y = _basic_block_forward(y, blk)
        feats.append(y)
    return feats


def _fpn_lateral(p, skip, w, b):
    # nearest x2 upsample of p is a pure layout op; fused into the 1x1 skip
    # conv's residual-add epilogue.
    p_up = jnp.repeat(jnp.repeat(p, 2, axis=1), 2, axis=2)
    return conv1x1(skip, w, shift=b, res=p_up)


def _seg_conv_block(x, blk):
    y = conv3x3_s1(x, blk['w'])                 # bias-free conv (GN follows)
    y = group_norm_relu(y, blk['gamma'], blk['beta'], groups=32)
    if blk['upsample']:
        y = bilinear_x2(y)
    return y


def _decoder_forward(feats, P):
    c2, c3, c4, c5 = feats[-4:]
    p5 = conv1x1(c5, P['p5_w'], shift=P['p5_b'])
    p4 = _fpn_lateral(p5, c4, P['p4_w'], P['p4_b'])
    p3 = _fpn_lateral(p4, c3, P['p3_w'], P['p3_b'])
    p2 = _fpn_lateral(p3, c2, P['p2_w'], P['p2_b'])
    pyr = []
    for blocks, p in zip(P['seg'], [p5, p4, p3, p2]):
        y = p
        for blk in blocks:
            y = _seg_conv_block(y, blk)
        pyr.append(y)
    x = merge_sum4(pyr)
    # TODO(synk): Dropout2d(p=0.2) is identity here (inference semantics).
    return x


def fpn_forward(x_nhwc, P):
    # The PyTorch module permutes NHWC->NCHW because its convs are NCHW; our
    # convs are NHWC, so we consume NHWC directly (same semantics).
    x = x_nhwc.astype(ACT_DTYPE)
    feats = _encoder_forward(x, P)
    dec = _decoder_forward(feats, P)
    logits = conv1x1(dec, P['out_w'], shift=P['out_b'])     # 1x1 head
    out = bilinear_x4_sigmoid(logits)                       # x4 bilinear + sigmoid
    return jnp.transpose(out, (0, 3, 1, 2))                 # NCHW like the module


# ----------------------------------------------------------------------------

if __name__ == "__main__":
    key = jax.random.PRNGKey(0)
    k_params, k_x = jax.random.split(key)
    params = init_fpn_params(k_params)
    # NHWC input; 64x64 so the deepest encoder feature is 2x2.
    x = jax.random.normal(k_x, (2, 64, 64, 3), jnp.float32)
    out = fpn_forward(x, params)
    out = jax.block_until_ready(out)
    assert out.shape == (2, 1, 64, 64), out.shape
    assert bool(jnp.all(jnp.isfinite(out)))
    assert bool(jnp.all((out >= 0.0) & (out <= 1.0)))
    print("KERNEL_OK")
</pallas_src>

<mosaic_0001>
module attributes {stable_mosaic.version = 11 : i64} {
  func.func @_mm_kernel(%arg0: i32, %arg1: i32, %arg2: memref<512x147xbf16, #tpu.memory_space<vmem>>, %arg3: memref<147x64xbf16, #tpu.memory_space<vmem>>, %arg4: memref<1x64xf32, #tpu.memory_space<vmem>>, %arg5: memref<1x64xf32, #tpu.memory_space<vmem>>, %arg6: memref<512x64xbf16, #tpu.memory_space<vmem>>) attributes {dimension_semantics = [#tpu.dimension_semantics<parallel>, #tpu.dimension_semantics<parallel>], iteration_bounds = array<i64: 4, 1>, scalar_prefetch = 0 : i64, scratch_operands = 0 : i64, tpu.core_type = #tpu.core_type<tc>, window_params = [{transform_indices = @transform_0, window_bounds = array<i64: 512, 147>}, {transform_indices = @transform_1, window_bounds = array<i64: 147, 64>}, {transform_indices = @transform_2, window_bounds = array<i64: 1, 64>}, {transform_indices = @transform_3, window_bounds = array<i64: 1, 64>}, {transform_indices = @transform_4, window_bounds = array<i64: 512, 64>}]} {
    %c0 = arith.constant 0 : index
    %c0_0 = arith.constant 0 : index
    %0 = vector.load %arg2[%c0, %c0_0] : memref<512x147xbf16, #tpu.memory_space<vmem>>, vector<512x147xbf16>
    %c0_1 = arith.constant 0 : index
    %c0_2 = arith.constant 0 : index
    %1 = vector.load %arg3[%c0_1, %c0_2] : memref<147x64xbf16, #tpu.memory_space<vmem>>, vector<147x64xbf16>
    %cst = arith.constant dense<0.000000e+00> : vector<512x64xf32>
    %2 = tpu.matmul %0, %1, %cst {dimension_numbers = #tpu.dot_dimension_numbers<[1], [0], [0], [1], [0, 0, 1, 1], [], []>} : vector<512x147xbf16>, vector<147x64xbf16>, vector<512x64xf32> -> vector<512x64xf32>
    %c0_3 = arith.constant 0 : index
    %c0_4 = arith.constant 0 : index
    %3 = vector.load %arg4[%c0_3, %c0_4] : memref<1x64xf32, #tpu.memory_space<vmem>>, vector<1x64xf32>
    %4 = vector.broadcast %3 : vector<1x64xf32> to vector<512x64xf32>
    %5 = arith.mulf %2, %4 : vector<512x64xf32>
    %c0_5 = arith.constant 0 : index
    %c0_6 = arith.constant 0 : index
    %6 = vector.load %arg5[%c0_5, %c0_6] : memref<1x64xf32, #tpu.memory_space<vmem>>, vector<1x64xf32>
    %7 = vector.broadcast %6 : vector<1x64xf32> to vector<512x64xf32>
    %8 = arith.addf %5, %7 : vector<512x64xf32>
    %cst_7 = arith.constant 0.000000e+00 : f32
    %9 = vector.broadcast %cst_7 : f32 to vector<512x64xf32>
    %10 = arith.maximumf %8, %9 : vector<512x64xf32>
    %11 = arith.truncf %10 : vector<512x64xf32> to vector<512x64xbf16>
    %c0_8 = arith.constant 0 : index
    %c0_9 = arith.constant 0 : index
    %12 = vector.load %arg6[%c0_8, %c0_9] : memref<512x64xbf16, #tpu.memory_space<vmem>>, vector<512x64xbf16>
    tpu.vector_store %arg6[%c0_8, %c0_9], %11 {strides = array<i32>} : memref<512x64xbf16, #tpu.memory_space<vmem>>, vector<512x64xbf16>,
    return
  }
  func.func @transform_0(%arg0: i32, %arg1: i32) -> (i32, i32) {
    %c0_i32 = arith.constant 0 : i32
    %c0_i32_0 = arith.constant 0 : i32
    return %arg0, %c0_i32 : i32, i32
  }
  func.func @transform_1(%arg0: i32, %arg1: i32) -> (i32, i32) {
    %c0_i32 = arith.constant 0 : i32
    %c0_i32_0 = arith.constant 0 : i32
    return %c0_i32, %arg1 : i32, i32
  }
  func.func @transform_2(%arg0: i32, %arg1: i32) -> (i32, i32) {
    %c0_i32 = arith.constant 0 : i32
    %c0_i32_0 = arith.constant 0 : i32
    return %c0_i32, %arg1 : i32, i32
  }
  func.func @transform_3(%arg0: i32, %arg1: i32) -> (i32, i32) {
    %c0_i32 = arith.constant 0 : i32
    %c0_i32_0 = arith.constant 0 : i32
    return %c0_i32, %arg1 : i32, i32
  }
  func.func @transform_4(%arg0: i32, %arg1: i32) -> (i32, i32) {
    %c0_i32 = arith.constant 0 : i32
    return %arg0, %arg1 : i32, i32
  }
}

</mosaic_0001>

<bundles_post_ra>
// kernel: tpu_custom_call.1
= control target key start
LH: loop header
LB: loop body
LE: loop exit
PB: predicated region body
PF: predicated region fallthrough
CT: control target
= control target key end

     0   :  { %s2187_s15 = smov 0   ;;  %s2189_s16 = smov 0   ;;  %s2620_s0 = inlined_call_operand.vmem [shape: bf16[2048,147], index: 0, kind: input, shape index: {}]   ;;  %s2621_s1 = inlined_call_operand.vmem [shape: bf16[147,64], index: 1, kind: input, shape index: {}]   ;;  %s2622_s2 = inlined_call_operand.vmem [shape: f32[1,64], index: 2, kind: input, shape index: {}]   ;;  %s2623_s3 = inlined_call_operand.vmem [shape: f32[1,64], index: 3, kind: input, shape index: {}]   ;;  %s2624_s4 = inlined_call_operand.vmem [shape: bf16[2048,64], index: 4, kind: output, shape index: {}]  }
   0x1   :  { %s2191_s17 = smov 0  }
   0x2 LB: > { %s26_s18 = sadd.s32 1, %s2154_s16  ;;  %p1739_p0 = scmp.ge.s32.totalorder %s2158_s17, 1  ;;  %s2158_s17 = sphi %s2191_s17, %s14_s17   ;;  %s2154_s16 = sphi %s2189_s16, %s2626_s16   ;;  %s2150_s15 = sphi %s2187_s15, %s2625_s15  }
   0x3   : > { %p28_p1 = scmp.ge.s32.totalorder %s26_s18, 4  ;;  %p203_p2 = scmp.lt.s32.totalorder %s2158_s17, 5 }
   0x5   : > { %s2628_s18 = smov (%p28_p1, %s26_s18), 0  ;;  %p204_p3 = pnand %p1739_p0, %p203_p2 }
   0x6   : > { %v2030_v0 = vld [vmem:[%s2621_s1] sm:$0xff] (!%p204_p3)   ;;  %v2160_v1 = vmov (!%p204_p3), 0   ;;  %v2031_v2 = vld [vmem:[%s2621_s1 + $0x8] sm:$0xff] (!%p204_p3)   ;;  %v2032_v3 = vld [vmem:[%s2621_s1 + $0x10] sm:$0xff] (!%p204_p3)   ;;  %s1740_s25 = sshll.u32 (!%p204_p3), %s2150_s15, 6  ;;  %vm698_vm0 = vcmask (!%p204_p3), 154624  }
   0x7   : > { %207 = sbr.rel (%p204_p3) target bundleno = 390 (0x186), region = 36  ;;  %802 = vmatprep.subr.bf16.mxu0 (!%p204_p3), %v2160_v1  ;;  %1984 = vmatprep.subr.bf16.mxu1 (!%p204_p3), %v2160_v1  ;;  %p244_p4 = scmp.lt.s32.totalorder (!%p204_p3), %s1740_s25, 255  ;;  %v2033_v4 = vld [vmem:[%s2621_s1 + $0x18] sm:$0xff] (!%p204_p3)   ;;  %v2034_v5 = vld [vmem:[%s2621_s1 + $0x20] sm:$0xff] (!%p204_p3)   ;;  %v2035_v8 = vld [vmem:[%s2621_s1 + $0x28] sm:$0xff] (!%p204_p3)   ;;  %vm795_vm1 = vcmask (!%p204_p3), 1040384  }
   0x8   : > { %803 = vmatpush1.bf16.msra.mxu0 (!%p204_p3), %v2030_v0  ;;  %1994 = vmatpush1.bf16.msra.mxu1 (!%p204_p3), %v2030_v0  ;;  %v2036_v9 = vld [vmem:[%s2621_s1 + $0x30] sm:$0xff] (!%p204_p3)   ;;  %v2037_v10 = vld [vmem:[%s2621_s1 + $0x38] sm:$0xff] (!%p204_p3)   ;;  %vm796_vm2 = vcmask (!%p204_p3), 1041408   ;;  %v2161_v11 = vmov (!%p204_p3), 65535   ;;  %v2038_v13 = vld [vmem:[%s2621_s1 + $0x40] sm:$0xff] (!%p204_p3)   ;;  %vm1553_vm3 = vcmask (!%p204_p3), 519168  }
   0x9   : > { %804 = vmatprep.subr.bf16.mxu0 (!%p204_p3), %v2160_v1  ;;  %1985 = vmatprep.subr.bf16.mxu1 (!%p204_p3), %v2160_v1  ;;  %v797_v12 = vsel (!%p204_p3), %vm795_vm1, 4294967295, %v2161_v11  ;;  %v2039_v14 = vld [vmem:[%s2621_s1 + $0x48] ss:$0 sps:$4 sm:$0x33] (!%p204_p3)  }
   0xa   : > { %v798_v15 = vsel (!%p204_p3), %vm796_vm2, %v797_v12, 0 }
   0xb   : > { %v800_v16 = vand.u32 (!%p204_p3), %v2039_v14, %v798_v15  ;;  %v2342_v15 = vld [vmem:[%s2622_s2] ss:$0 sm:$0xff] (!%p204_p3) }
   0xc   : > { %805 = vmatpush1.bf16.msra.mxu0 (!%p204_p3), %v2031_v2  ;;  %1995 = vmatpush1.bf16.msra.mxu1 (!%p204_p3), %v2031_v2 }
   0xd   : > { %806 = vmatprep.subr.bf16.mxu0 (!%p204_p3), %v2160_v1  ;;  %1986 = vmatprep.subr.bf16.mxu1 (!%p204_p3), %v2160_v1 }
   0xe   : > { %s2630_s25 = smov (!%p244_p4, %s1740_s25), 255 }
   0xf   : > { %s1919_s28 = sshll.u32 %s2630_s25, 3  ;;  %s1744_s26 = sshll.u32 %s2630_s25, 2 }
  0x10   : > { %807 = vmatpush1.bf16.msra.mxu0 %v2032_v3  ;;  %1996 = vmatpush1.bf16.msra.mxu1 %v2032_v3  ;;  %s2223_s5 = scalar_lea.vmem %s2620_s0, %s1919_s28  ;;  %s2361_s25 = scalar_lea.vmem %s2624_s4, %s1744_s26 }
  0x11   : > { %808 = vmatprep.subr.bf16.mxu0 %v2160_v1  ;;  %1987 = vmatprep.subr.bf16.mxu1 %v2160_v1  ;;  %v2042_v6 = vld [vmem:[%s2223_s5 + $0x4] ss:$8 sps:$4 sm:$0xff]   ;;  %v2040_v17 = vld [vmem:[%s2223_s5] ss:$8 sps:$4 sm:$0xff]   ;;  %v2046_v19 = vld [vmem:[%s2223_s5 + $0x14] ss:$8 sps:$4 sm:$0xff]  }
  0x12   : > { %v2045_v7 = vld [vmem:[%s2223_s5 + $0x104] ss:$8 sps:$4 sm:$0xff]   ;;  %1819 = vmatprep.mubr.msk.bf16.mxu0 %vm698_vm0, %v2042_v6  ;;  %v2043_v18 = vld [vmem:[%s2223_s5 + $0x100] ss:$8 sps:$4 sm:$0xff]   ;;  %v2048_v20 = vld [vmem:[%s2223_s5 + $0x114] ss:$8 sps:$4 sm:$0xff]  }
  0x13   : > { %1835 = vmatprep.mubr.msk.bf16.mxu1 %vm698_vm0, %v2045_v7  ;;  %v2050_v21 = vld [vmem:[%s2223_s5 + $0x10] ss:$8 sps:$4 sm:$0xff]   ;;  %v2052_v23 = vld [vmem:[%s2223_s5 + $0x24] ss:$8 sps:$4 sm:$0xff]   ;;  %v2056_v25 = vld [vmem:[%s2223_s5 + $0x20] ss:$8 sps:$4 sm:$0xff]  }
  0x14   : > { %809 = vmatpush1.bf16.msra.mxu0 %v2033_v4  ;;  %1997 = vmatpush1.bf16.msra.mxu1 %v2033_v4  ;;  %v2051_v22 = vld [vmem:[%s2223_s5 + $0x110] ss:$8 sps:$4 sm:$0xff]   ;;  %v2054_v24 = vld [vmem:[%s2223_s5 + $0x124] ss:$8 sps:$4 sm:$0xff]   ;;  %v2057_v26 = vld [vmem:[%s2223_s5 + $0x120] ss:$8 sps:$4 sm:$0xff]  }
  0x15   : > { %810 = vmatprep.subr.bf16.mxu0 %v2160_v1  ;;  %1988 = vmatprep.subr.bf16.mxu1 %v2160_v1  ;;  %v2058_v27 = vld [vmem:[%s2223_s5 + $0x34] ss:$8 sps:$4 sm:$0xff]   ;;  %v2062_v29 = vld [vmem:[%s2223_s5 + $0x30] ss:$8 sps:$4 sm:$0xff]   ;;  %v2064_v31 = vld [vmem:[%s2223_s5 + $0x44] ss:$8 sps:$4 sm:$0xff]  }
  0x16   : > { %v2060_v28 = vld [vmem:[%s2223_s5 + $0x134] ss:$8 sps:$4 sm:$0xff]   ;;  %v2063_v30 = vld [vmem:[%s2223_s5 + $0x130] ss:$8 sps:$4 sm:$0xff]   ;;  %v2066_v32 = vld [vmem:[%s2223_s5 + $0x144] ss:$8 sps:$4 sm:$0xff]  }
  0x17   : > { %v2068_v33 = vld [vmem:[%s2223_s5 + $0x40] ss:$8 sps:$4 sm:$0xff]   ;;  %v2070_v35 = vld [vmem:[%s2223_s5 + $0x54] ss:$8 sps:$4 sm:$0xff]   ;;  %v2074_v37 = vld [vmem:[%s2223_s5 + $0x50] ss:$8 sps:$4 sm:$0xff]  }
  0x18   : > { %811 = vmatpush1.bf16.msra.mxu0 %v2034_v5  ;;  %1998 = vmatpush1.bf16.msra.mxu1 %v2034_v5  ;;  %v2069_v34 = vld [vmem:[%s2223_s5 + $0x140] ss:$8 sps:$4 sm:$0xff]   ;;  %v2072_v36 = vld [vmem:[%s2223_s5 + $0x154] ss:$8 sps:$4 sm:$0xff]   ;;  %v2075_v38 = vld [vmem:[%s2223_s5 + $0x150] ss:$8 sps:$4 sm:$0xff]  }
  0x19   : > { %812 = vmatprep.subr.bf16.mxu0 %v2160_v1  ;;  %1989 = vmatprep.subr.bf16.mxu1 %v2160_v1  ;;  %v2076_v39 = vld [vmem:[%s2223_s5 + $0x64] ss:$8 sps:$4 sm:$0xff]   ;;  %v2080_v41 = vld [vmem:[%s2223_s5 + $0x60] ss:$8 sps:$4 sm:$0xff]   ;;  %v2082_v43 = vld [vmem:[%s2223_s5 + $0x74] ss:$8 sps:$4 sm:$0xff]  }
  0x1a   : > { %v2078_v40 = vld [vmem:[%s2223_s5 + $0x164] ss:$8 sps:$4 sm:$0xff]   ;;  %v2081_v42 = vld [vmem:[%s2223_s5 + $0x160] ss:$8 sps:$4 sm:$0xff]   ;;  %v2084_v44 = vld [vmem:[%s2223_s5 + $0x174] ss:$8 sps:$4 sm:$0xff]  }
  0x1b   : > { %v2086_v45 = vld [vmem:[%s2223_s5 + $0x70] ss:$8 sps:$4 sm:$0xff]   ;;  %v2088_v47 = vld [vmem:[%s2223_s5 + $0x84] ss:$8 sps:$4 sm:$0xff]   ;;  %v2092_v49 = vld [vmem:[%s2223_s5 + $0x80] ss:$8 sps:$4 sm:$0xff]  }
  0x1c   : > { %813 = vmatpush1.bf16.msra.mxu0 %v2035_v8  ;;  %1999 = vmatpush1.bf16.msra.mxu1 %v2035_v8  ;;  %v2087_v46 = vld [vmem:[%s2223_s5 + $0x170] ss:$8 sps:$4 sm:$0xff]   ;;  %v2090_v48 = vld [vmem:[%s2223_s5 + $0x184] ss:$8 sps:$4 sm:$0xff]   ;;  %v2093_v50 = vld [vmem:[%s2223_s5 + $0x180] ss:$8 sps:$4 sm:$0xff]  }
  0x1d   : > { %814 = vmatprep.subr.bf16.mxu0 %v2160_v1  ;;  %1990 = vmatprep.subr.bf16.mxu1 %v2160_v1  ;;  %v2094_v51 = vld [vmem:[%s2223_s5 + $0x94] ss:$8 sps:$4 sm:$0xff]   ;;  %v2098_v53 = vld [vmem:[%s2223_s5 + $0x90] ss:$8 sps:$4 sm:$0xff]   ;;  %v2100_v55 = vld [vmem:[%s2223_s5 + $0xa4] ss:$8 sps:$4 sm:$0xff]  }
  0x1e   : > { %v2096_v52 = vld [vmem:[%s2223_s5 + $0x194] ss:$8 sps:$4 sm:$0xff]   ;;  %v2099_v54 = vld [vmem:[%s2223_s5 + $0x190] ss:$8 sps:$4 sm:$0xff]   ;;  %v2102_v56 = vld [vmem:[%s2223_s5 + $0x1a4] ss:$8 sps:$4 sm:$0xff]  }
  0x1f   : > { %v2104_v57 = vld [vmem:[%s2223_s5 + $0xa0] ss:$8 sps:$4 sm:$0xff]   ;;  %v2106_v59 = vld [vmem:[%s2223_s5 + $0xb4] ss:$8 sps:$4 sm:$0xff]   ;;  %v2110_v61 = vld [vmem:[%s2223_s5 + $0xb0] ss:$8 sps:$4 sm:$0xff]  }
  0x20   : > { %815 = vmatpush1.bf16.msra.mxu0 %v2036_v9  ;;  %2000 = vmatpush1.bf16.msra.mxu1 %v2036_v9  ;;  %v2105_v58 = vld [vmem:[%s2223_s5 + $0x1a0] ss:$8 sps:$4 sm:$0xff]   ;;  %v2108_v60 = vld [vmem:[%s2223_s5 + $0x1b4] ss:$8 sps:$4 sm:$0xff]   ;;  %v2111_v62 = vld [vmem:[%s2223_s5 + $0x1b0] ss:$8 sps:$4 sm:$0xff]  }
  0x21   : > { %816 = vmatprep.subr.bf16.mxu0 %v2160_v1  ;;  %1991 = vmatprep.subr.bf16.mxu1 %v2160_v1  ;;  %v2112_v63 = vld [vmem:[%s2223_s5 + $0xc4] ss:$8 sps:$4 sm:$0xff]   ;;  %v2117_v2 = vld [vmem:[%s2223_s5 + $0x1c0] ss:$8 sps:$4 sm:$0xff]   ;;  %v2118_v3 = vld [vmem:[%s2223_s5 + $0xd4] ss:$8 sps:$4 sm:$0xff]  }
  0x22   : > { %v2114_v0 = vld [vmem:[%s2223_s5 + $0x1c4] ss:$8 sps:$4 sm:$0xff]   ;;  %v2120_v4 = vld [vmem:[%s2223_s5 + $0x1d4] ss:$8 sps:$4 sm:$0xff]   ;;  %v2122_v5 = vld [vmem:[%s2223_s5 + $0xd0] ss:$8 sps:$4 sm:$0xff]  }
  0x23   : > { %v2123_v6 = vld [vmem:[%s2223_s5 + $0x1d0] ss:$8 sps:$4 sm:$0xff]   ;;  %v2124_v7 = vld [vmem:[%s2223_s5 + $0xe4] ss:$8 sps:$4 sm:$0xff]   ;;  %v2128_v9 = vld [vmem:[%s2223_s5 + $0xe0] ss:$8 sps:$4 sm:$0xff]  }
  0x24   : > { %817 = vmatpush1.bf16.msra.mxu0 %v2037_v10  ;;  %2001 = vmatpush1.bf16.msra.mxu1 %v2037_v10  ;;  %v2126_v8 = vld [vmem:[%s2223_s5 + $0x1e4] ss:$8 sps:$4 sm:$0xff]   ;;  %v2129_v10 = vld [vmem:[%s2223_s5 + $0x1e0] ss:$8 sps:$4 sm:$0xff]   ;;  %v2130_v11 = vld [vmem:[%s2223_s5 + $0xf4] ss:$8 sps:$4 sm:$0xff]  }
  0x25   : > { %818 = vmatprep.subr.bf16.mxu0 %v2160_v1  ;;  %1992 = vmatprep.subr.bf16.mxu1 %v2160_v1  ;;  %v2132_v12 = vld [vmem:[%s2223_s5 + $0x1f4] ss:$8 sps:$4 sm:$0xff]   ;;  %v2135_v14 = vld [vmem:[%s2223_s5 + $0x1f0] ss:$8 sps:$4 sm:$0xff]  }
  0x28   : > { %819 = vmatpush1.bf16.msra.mxu0 %v2038_v13  ;;  %2002 = vmatpush1.bf16.msra.mxu1 %v2038_v13  ;;  %v2134_v13 = vld [vmem:[%s2223_s5 + $0xf0] ss:$8 sps:$4 sm:$0xff]  }
  0x29   : > { %820 = vmatprep.subr.bf16.mxu0 %v2160_v1  ;;  %1993 = vmatprep.subr.bf16.mxu1 %v2160_v1  ;;  %v2116_v1 = vld [vmem:[%s2223_s5 + $0xc0] ss:$8 sps:$4 sm:$0xff]  }
  0x2c   : > { %821 = vmatpush1.bf16.msra.mxu0 %v800_v16  ;;  %2003 = vmatpush1.bf16.msra.mxu1 %v800_v16 }
  0x2f   : > { %835 = vmatmul.mubr.bf16.vlgmr.msra.gmra.mrb[0].mxu0 %v2040_v17  ;;  %963 = vmatmul.mubr.bf16.vlgmr.msra.gmra.mrb[0].mxu1 %v2043_v18  ;;  %v2347_v17 = vld [vmem:[%s2623_s3] ss:$0 sm:$0xff] }
  0x30   : > { %1820 = vmatprep.mubr.msk.bf16.mxu0 %vm698_vm0, %v2046_v19  ;;  %1836 = vmatprep.mubr.msk.bf16.mxu1 %vm698_vm0, %v2048_v20 }
  0x37   : > { %843 = vmatmul.mubr.bf16.gmra.mrb[4].mxu0 %v2050_v21  ;;  %971 = vmatmul.mubr.bf16.gmra.mrb[4].mxu1 %v2051_v22 }
  0x38   : > { %1821 = vmatprep.mubr.msk.bf16.mxu0 %vm698_vm0, %v2052_v23  ;;  %1837 = vmatprep.mubr.msk.bf16.mxu1 %vm698_vm0, %v2054_v24 }
  0x3f   : > { %851 = vmatmul.mubr.bf16.gmra.mrb[8].mxu0 %v2056_v25  ;;  %979 = vmatmul.mubr.bf16.gmra.mrb[8].mxu1 %v2057_v26 }
  0x40   : > { %1822 = vmatprep.mubr.msk.bf16.mxu0 %vm698_vm0, %v2058_v27  ;;  %1838 = vmatprep.mubr.msk.bf16.mxu1 %vm698_vm0, %v2060_v28 }
  0x47   : > { %859 = vmatmul.mubr.bf16.gmra.mrb[12].mxu0 %v2062_v29  ;;  %987 = vmatmul.mubr.bf16.gmra.mrb[12].mxu1 %v2063_v30 }
  0x48   : > { %1823 = vmatprep.mubr.msk.bf16.mxu0 %vm698_vm0, %v2064_v31  ;;  %1839 = vmatprep.mubr.msk.bf16.mxu1 %vm698_vm0, %v2066_v32 }
  0x4f   : > { %867 = vmatmul.mubr.bf16.gmra.mrb[16].mxu0 %v2068_v33  ;;  %995 = vmatmul.mubr.bf16.gmra.mrb[16].mxu1 %v2069_v34 }
  0x50   : > { %1824 = vmatprep.mubr.msk.bf16.mxu0 %vm698_vm0, %v2070_v35  ;;  %1840 = vmatprep.mubr.msk.bf16.mxu1 %vm698_vm0, %v2072_v36 }
  0x57   : > { %875 = vmatmul.mubr.bf16.gmra.mrb[20].mxu0 %v2074_v37  ;;  %1003 = vmatmul.mubr.bf16.gmra.mrb[20].mxu1 %v2075_v38 }
  0x58   : > { %1825 = vmatprep.mubr.msk.bf16.mxu0 %vm698_vm0, %v2076_v39  ;;  %1841 = vmatprep.mubr.msk.bf16.mxu1 %vm698_vm0, %v2078_v40 }
  0x5f   : > { %883 = vmatmul.mubr.bf16.gmra.mrb[24].mxu0 %v2080_v41  ;;  %1011 = vmatmul.mubr.bf16.gmra.mrb[24].mxu1 %v2081_v42 }
  0x60   : > { %1826 = vmatprep.mubr.msk.bf16.mxu0 %vm698_vm0, %v2082_v43  ;;  %1842 = vmatprep.mubr.msk.bf16.mxu1 %vm698_vm0, %v2084_v44 }
  0x67   : > { %891 = vmatmul.mubr.bf16.gmra.mrb[28].mxu0 %v2086_v45  ;;  %1019 = vmatmul.mubr.bf16.gmra.mrb[28].mxu1 %v2087_v46 }
  0x68   : > { %1827 = vmatprep.mubr.msk.bf16.mxu0 %vm698_vm0, %v2088_v47  ;;  %1843 = vmatprep.mubr.msk.bf16.mxu1 %vm698_vm0, %v2090_v48 }
  0x6f   : > { %899 = vmatmul.mubr.bf16.gmra.mrb[32].mxu0 %v2092_v49  ;;  %1027 = vmatmul.mubr.bf16.gmra.mrb[32].mxu1 %v2093_v50 }
  0x70   : > { %1828 = vmatprep.mubr.msk.bf16.mxu0 %vm698_vm0, %v2094_v51  ;;  %1844 = vmatprep.mubr.msk.bf16.mxu1 %vm698_vm0, %v2096_v52 }
  0x77   : > { %907 = vmatmul.mubr.bf16.gmra.mrb[36].mxu0 %v2098_v53  ;;  %1035 = vmatmul.mubr.bf16.gmra.mrb[36].mxu1 %v2099_v54 }
  0x78   : > { %1829 = vmatprep.mubr.msk.bf16.mxu0 %vm698_vm0, %v2100_v55  ;;  %1845 = vmatprep.mubr.msk.bf16.mxu1 %vm698_vm0, %v2102_v56 }
  0x7f   : > { %915 = vmatmul.mubr.bf16.gmra.mrb[40].mxu0 %v2104_v57  ;;  %1043 = vmatmul.mubr.bf16.gmra.mrb[40].mxu1 %v2105_v58 }
  0x80   : > { %1830 = vmatprep.mubr.msk.bf16.mxu0 %vm698_vm0, %v2106_v59  ;;  %1846 = vmatprep.mubr.msk.bf16.mxu1 %vm698_vm0, %v2108_v60 }
  0x87   : > { %923 = vmatmul.mubr.bf16.gmra.mrb[44].mxu0 %v2110_v61  ;;  %1051 = vmatmul.mubr.bf16.gmra.mrb[44].mxu1 %v2111_v62 }
  0x88   : > { %1831 = vmatprep.mubr.msk.bf16.mxu0 %vm698_vm0, %v2112_v63  ;;  %1847 = vmatprep.mubr.msk.bf16.mxu1 %vm698_vm0, %v2114_v0 }
  0x8f   : > { %931 = vmatmul.mubr.bf16.gmra.mrb[48].mxu0 %v2116_v1  ;;  %1059 = vmatmul.mubr.bf16.gmra.mrb[48].mxu1 %v2117_v2 }
  0x90   : > { %1832 = vmatprep.mubr.msk.bf16.mxu0 %vm698_vm0, %v2118_v3  ;;  %1848 = vmatprep.mubr.msk.bf16.mxu1 %vm698_vm0, %v2120_v4 }
  0x97   : > { %939 = vmatmul.mubr.bf16.gmra.mrb[52].mxu0 %v2122_v5  ;;  %1067 = vmatmul.mubr.bf16.gmra.mrb[52].mxu1 %v2123_v6 }
  0x98   : > { %1833 = vmatprep.mubr.msk.bf16.mxu0 %vm698_vm0, %v2124_v7  ;;  %1849 = vmatprep.mubr.msk.bf16.mxu1 %vm698_vm0, %v2126_v8 }
  0x9f   : > { %947 = vmatmul.mubr.bf16.gmra.mrb[56].mxu0 %v2128_v9  ;;  %1075 = vmatmul.mubr.bf16.gmra.mrb[56].mxu1 %v2129_v10 }
  0xa0   : > { %1834 = vmatprep.mubr.msk.bf16.mxu0 %vm698_vm0, %v2130_v11  ;;  %1850 = vmatprep.mubr.msk.bf16.mxu1 %vm698_vm0, %v2132_v12 }
  0xa7   : > { %955 = vmatmul.mubr.bf16.gmra.mrb[60].mxu0 %v2134_v13  ;;  %1083 = vmatmul.mubr.bf16.gmra.mrb[60].mxu1 %v2135_v14 }
 0x102   : > { %v836_v16 = vpop.f32.mrb[0].mxu0  ;;  %v964_v18 = vpop.f32.mrb[0].mxu1 }
 0x103   : > { %v1098_v19 = vmul.f32 %v2342_v15, %v836_v16  ;;  %v1130_v20 = vmul.f32 %v2342_v15, %v964_v18  ;;  %v838_v21 = vpop.f32.mrb[1].mxu0  ;;  %v966_v22 = vpop.f32.mrb[1].mxu1 }
 0x104   : > { %v839_v23 = vpop.f32.mrb[2].mxu0  ;;  %v967_v24 = vpop.f32.mrb[2].mxu1 }
 0x105   : > { %v1169_v25 = vadd.f32 %v2347_v17, %v1098_v19  ;;  %v1201_v26 = vadd.f32 %v2347_v17, %v1130_v20  ;;  %v1099_v27 = vmul.f32 %v2342_v15, %v839_v23  ;;  %v1131_v28 = vmul.f32 %v2342_v15, %v967_v24  ;;  %v841_v29 = vpop.f32.mrb[3].mxu0  ;;  %v969_v30 = vpop.f32.mrb[3].mxu1 }
 0x107   : > { %v1233_v31 = vmax.f32 %v1169_v25, 0.0  ;;  %v1265_v32 = vmax.f32 %v1201_v26, 0.0  ;;  %v1170_v33 = vadd.f32 %v2347_v17, %v1099_v27  ;;  %v1202_v34 = vadd.f32 %v2347_v17, %v1131_v28 }
 0x109   : > { %v1920_v35 = vpack.c.bf16 %v1233_v31, %v1233_v31  ;;  %v1952_v36 = vpack.c.bf16 %v1265_v32, %v1265_v32  ;;  %v1234_v37 = vmax.f32 %v1170_v33, 0.0  ;;  %v1266_v38 = vmax.f32 %v1202_v34, 0.0 }
 0x10a   : > { %v844_v39 = vpop.f32.mrb[4].mxu0  ;;  %v972_v40 = vpop.f32.mrb[4].mxu1 }
 0x10b   : > { %1554 = vst.msk [vmem:[%s2361_s25] sm:$0xf] %vm1553_vm3, %v1920_v35  ;;  %1586 = vst.msk [vmem:[%s2361_s25 + $0x80] sm:$0xf] %vm1553_vm3, %v1952_v36  ;;  %v1921_v41 = vpack.c.bf16 %v1234_v37, %v1234_v37  ;;  %v1953_v42 = vpack.c.bf16 %v1266_v38, %v1266_v38  ;;  %v1100_v43 = vmul.f32 %v2342_v15, %v844_v39  ;;  %v846_v45 = vpop.f32.mrb[5].mxu0  ;;  %v974_v46 = vpop.f32.mrb[5].mxu1 }
 0x10c   : > { %v1132_v44 = vmul.f32 %v2342_v15, %v972_v40  ;;  %v847_v47 = vpop.f32.mrb[6].mxu0  ;;  %v975_v48 = vpop.f32.mrb[6].mxu1 }
 0x10d   : > { %1555 = vst.msk [vmem:[%s2361_s25 + $0x4] sm:$0xf] %vm1553_vm3, %v1921_v41  ;;  %1587 = vst.msk [vmem:[%s2361_s25 + $0x84] sm:$0xf] %vm1553_vm3, %v1953_v42  ;;  %v1171_v49 = vadd.f32 %v2347_v17, %v1100_v43  ;;  %v1101_v51 = vmul.f32 %v2342_v15, %v847_v47  ;;  %v1133_v52 = vmul.f32 %v2342_v15, %v975_v48  ;;  %v849_v53 = vpop.f32.mrb[7].mxu0  ;;  %v977_v54 = vpop.f32.mrb[7].mxu1 }
 0x10e   : > { %v1203_v50 = vadd.f32 %v2347_v17, %v1132_v44 }
 0x10f   : > { %v1235_v55 = vmax.f32 %v1171_v49, 0.0  ;;  %v1172_v57 = vadd.f32 %v2347_v17, %v1101_v51  ;;  %v1204_v58 = vadd.f32 %v2347_v17, %v1133_v52 }
 0x110   : > { %v1267_v56 = vmax.f32 %v1203_v50, 0.0 }
 0x111   : > { %v1922_v59 = vpack.c.bf16 %v1235_v55, %v1235_v55  ;;  %v1236_v61 = vmax.f32 %v1172_v57, 0.0  ;;  %v1268_v62 = vmax.f32 %v1204_v58, 0.0 }
 0x112   : > { %v1954_v60 = vpack.c.bf16 %v1267_v56, %v1267_v56  ;;  %v852_v63 = vpop.f32.mrb[8].mxu0  ;;  %v980_v0 = vpop.f32.mrb[8].mxu1 }
 0x113   : > { %1556 = vst.msk [vmem:[%s2361_s25 + $0x8] sm:$0xf] %vm1553_vm3, %v1922_v59  ;;  %v1923_v1 = vpack.c.bf16 %v1236_v61, %v1236_v61  ;;  %v1955_v2 = vpack.c.bf16 %v1268_v62, %v1268_v62  ;;  %v1102_v3 = vmul.f32 %v2342_v15, %v852_v63  ;;  %v1134_v4 = vmul.f32 %v2342_v15, %v980_v0  ;;  %v854_v5 = vpop.f32.mrb[9].mxu0  ;;  %v982_v6 = vpop.f32.mrb[9].mxu1 }
 0x114   : > { %1588 = vst.msk [vmem:[%s2361_s25 + $0x88] sm:$0xf] %vm1553_vm3, %v1954_v60  ;;  %v855_v7 = vpop.f32.mrb[10].mxu0  ;;  %v983_v8 = vpop.f32.mrb[10].mxu1 }
 0x115   : > { %1557 = vst.msk [vmem:[%s2361_s25 + $0xc] sm:$0xf] %vm1553_vm3, %v1923_v1  ;;  %1589 = vst.msk [vmem:[%s2361_s25 + $0x8c] sm:$0xf] %vm1553_vm3, %v1955_v2  ;;  %v1173_v9 = vadd.f32 %v2347_v17, %v1102_v3  ;;  %v1205_v10 = vadd.f32 %v2347_v17, %v1134_v4  ;;  %v1103_v11 = vmul.f32 %v2342_v15, %v855_v7  ;;  %v857_v13 = vpop.f32.mrb[11].mxu0  ;;  %v985_v14 = vpop.f32.mrb[11].mxu1 }
 0x116   : > { %v1135_v12 = vmul.f32 %v2342_v15, %v983_v8 }
 0x117   : > { %v1237_v16 = vmax.f32 %v1173_v9, 0.0  ;;  %v1269_v18 = vmax.f32 %v1205_v10, 0.0  ;;  %v1174_v19 = vadd.f32 %v2347_v17, %v1103_v11 }
 0x118   : > { %v1206_v20 = vadd.f32 %v2347_v17, %v1135_v12 }
 0x119   : > { %v1924_v21 = vpack.c.bf16 %v1237_v16, %v1237_v16  ;;  %v1956_v22 = vpack.c.bf16 %v1269_v18, %v1269_v18  ;;  %v1238_v23 = vmax.f32 %v1174_v19, 0.0 }
 0x11a   : > { %v1270_v24 = vmax.f32 %v1206_v20, 0.0  ;;  %v860_v25 = vpop.f32.mrb[12].mxu0  ;;  %v988_v26 = vpop.f32.mrb[12].mxu1 }
 0x11b   : > { %1558 = vst.msk [vmem:[%s2361_s25 + $0x10] sm:$0xf] %vm1553_vm3, %v1924_v21  ;;  %1590 = vst.msk [vmem:[%s2361_s25 + $0x90] sm:$0xf] %vm1553_vm3, %v1956_v22  ;;  %v1925_v27 = vpack.c.bf16 %v1238_v23, %v1238_v23  ;;  %v1104_v29 = vmul.f32 %v2342_v15, %v860_v25  ;;  %v1136_v30 = vmul.f32 %v2342_v15, %v988_v26  ;;  %v862_v31 = vpop.f32.mrb[13].mxu0  ;;  %v990_v32 = vpop.f32.mrb[13].mxu1 }
 0x11c   : > { %v1957_v28 = vpack.c.bf16 %v1270_v24, %v1270_v24  ;;  %v863_v33 = vpop.f32.mrb[14].mxu0  ;;  %v991_v34 = vpop.f32.mrb[14].mxu1 }
 0x11d   : > { %1559 = vst.msk [vmem:[%s2361_s25 + $0x14] sm:$0xf] %vm1553_vm3, %v1925_v27  ;;  %v1175_v35 = vadd.f32 %v2347_v17, %v1104_v29  ;;  %v1207_v36 = vadd.f32 %v2347_v17, %v1136_v30  ;;  %v1105_v37 = vmul.f32 %v2342_v15, %v863_v33  ;;  %v1137_v38 = vmul.f32 %v2342_v15, %v991_v34  ;;  %v865_v39 = vpop.f32.mrb[15].mxu0  ;;  %v993_v40 = vpop.f32.mrb[15].mxu1 }
 0x11e   : > { %1591 = vst.msk [vmem:[%s2361_s25 + $0x94] sm:$0xf] %vm1553_vm3, %v1957_v28 }
 0x11f   : > { %v1239_v41 = vmax.f32 %v1175_v35, 0.0  ;;  %v1271_v42 = vmax.f32 %v1207_v36, 0.0  ;;  %v1176_v43 = vadd.f32 %v2347_v17, %v1105_v37  ;;  %v1208_v44 = vadd.f32 %v2347_v17, %v1137_v38 }
 0x121   : > { %v1926_v45 = vpack.c.bf16 %v1239_v41, %v1239_v41  ;;  %v1958_v46 = vpack.c.bf16 %v1271_v42, %v1271_v42  ;;  %v1240_v47 = vmax.f32 %v1176_v43, 0.0  ;;  %v1272_v48 = vmax.f32 %v1208_v44, 0.0 }
 0x122   : > { %v868_v49 = vpop.f32.mrb[16].mxu0  ;;  %v996_v50 = vpop.f32.mrb[16].mxu1 }
 0x123   : > { %1560 = vst.msk [vmem:[%s2361_s25 + $0x18] sm:$0xf] %vm1553_vm3, %v1926_v45  ;;  %1592 = vst.msk [vmem:[%s2361_s25 + $0x98] sm:$0xf] %vm1553_vm3, %v1958_v46  ;;  %v1927_v51 = vpack.c.bf16 %v1240_v47, %v1240_v47  ;;  %v1959_v52 = vpack.c.bf16 %v1272_v48, %v1272_v48  ;;  %v1106_v53 = vmul.f32 %v2342_v15, %v868_v49  ;;  %v870_v55 = vpop.f32.mrb[17].mxu0  ;;  %v998_v56 = vpop.f32.mrb[17].mxu1 }
 0x124   : > { %v1138_v54 = vmul.f32 %v2342_v15, %v996_v50  ;;  %v871_v57 = vpop.f32.mrb[18].mxu0  ;;  %v999_v58 = vpop.f32.mrb[18].mxu1 }
 0x125   : > { %1561 = vst.msk [vmem:[%s2361_s25 + $0x1c] sm:$0xf] %vm1553_vm3, %v1927_v51  ;;  %1593 = vst.msk [vmem:[%s2361_s25 + $0x9c] sm:$0xf] %vm1553_vm3, %v1959_v52  ;;  %v1177_v59 = vadd.f32 %v2347_v17, %v1106_v53  ;;  %v1107_v61 = vmul.f32 %v2342_v15, %v871_v57  ;;  %v1139_v62 = vmul.f32 %v2342_v15, %v999_v58  ;;  %v873_v63 = vpop.f32.mrb[19].mxu0  ;;  %v1001_v0 = vpop.f32.mrb[19].mxu1 }
 0x126   : > { %v1209_v60 = vadd.f32 %v2347_v17, %v1138_v54 }
 0x127   : > { %v1241_v1 = vmax.f32 %v1177_v59, 0.0  ;;  %v1178_v3 = vadd.f32 %v2347_v17, %v1107_v61  ;;  %v1210_v4 = vadd.f32 %v2347_v17, %v1139_v62 }
 0x128   : > { %v1273_v2 = vmax.f32 %v1209_v60, 0.0 }
 0x129   : > { %v1928_v5 = vpack.c.bf16 %v1241_v1, %v1241_v1  ;;  %v1242_v7 = vmax.f32 %v1178_v3, 0.0  ;;  %v1274_v8 = vmax.f32 %v1210_v4, 0.0 }
 0x12a   : > { %v1960_v6 = vpack.c.bf16 %v1273_v2, %v1273_v2  ;;  %v876_v9 = vpop.f32.mrb[20].mxu0  ;;  %v1004_v10 = vpop.f32.mrb[20].mxu1 }
 0x12b   : > { %1562 = vst.msk [vmem:[%s2361_s25 + $0x20] sm:$0xf] %vm1553_vm3, %v1928_v5  ;;  %v1929_v11 = vpack.c.bf16 %v1242_v7, %v1242_v7  ;;  %v1961_v12 = vpack.c.bf16 %v1274_v8, %v1274_v8  ;;  %v1108_v13 = vmul.f32 %v2342_v15, %v876_v9  ;;  %v1140_v14 = vmul.f32 %v2342_v15, %v1004_v10  ;;  %v878_v16 = vpop.f32.mrb[21].mxu0  ;;  %v1006_v18 = vpop.f32.mrb[21].mxu1 }
 0x12c   : > { %1594 = vst.msk [vmem:[%s2361_s25 + $0xa0] sm:$0xf] %vm1553_vm3, %v1960_v6  ;;  %v879_v19 = vpop.f32.mrb[22].mxu0  ;;  %v1007_v20 = vpop.f32.mrb[22].mxu1 }
 0x12d   : > { %1563 = vst.msk [vmem:[%s2361_s25 + $0x24] sm:$0xf] %vm1553_vm3, %v1929_v11  ;;  %1595 = vst.msk [vmem:[%s2361_s25 + $0xa4] sm:$0xf] %vm1553_vm3, %v1961_v12  ;;  %v1179_v21 = vadd.f32 %v2347_v17, %v1108_v13  ;;  %v1211_v22 = vadd.f32 %v2347_v17, %v1140_v14  ;;  %v1109_v23 = vmul.f32 %v2342_v15, %v879_v19  ;;  %v881_v25 = vpop.f32.mrb[23].mxu0  ;;  %v1009_v26 = vpop.f32.mrb[23].mxu1 }
 0x12e   : > { %v1141_v24 = vmul.f32 %v2342_v15, %v1007_v20 }
 0x12f   : > { %v1243_v27 = vmax.f32 %v1179_v21, 0.0  ;;  %v1275_v28 = vmax.f32 %v1211_v22, 0.0  ;;  %v1180_v29 = vadd.f32 %v2347_v17, %v1109_v23 }
 0x130   : > { %v1212_v30 = vadd.f32 %v2347_v17, %v1141_v24 }
 0x131   : > { %v1930_v31 = vpack.c.bf16 %v1243_v27, %v1243_v27  ;;  %v1962_v32 = vpack.c.bf16 %v1275_v28, %v1275_v28  ;;  %v1244_v33 = vmax.f32 %v1180_v29, 0.0 }
 0x132   : > { %v1276_v34 = vmax.f32 %v1212_v30, 0.0  ;;  %v884_v35 = vpop.f32.mrb[24].mxu0  ;;  %v1012_v36 = vpop.f32.mrb[24].mxu1 }
 0x133   : > { %1564 = vst.msk [vmem:[%s2361_s25 + $0x28] sm:$0xf] %vm1553_vm3, %v1930_v31  ;;  %1596 = vst.msk [vmem:[%s2361_s25 + $0xa8] sm:$0xf] %vm1553_vm3, %v1962_v32  ;;  %v1931_v37 = vpack.c.bf16 %v1244_v33, %v1244_v33  ;;  %v1110_v39 = vmul.f32 %v2342_v15, %v884_v35  ;;  %v1142_v40 = vmul.f32 %v2342_v15, %v1012_v36  ;;  %v886_v41 = vpop.f32.mrb[25].mxu0  ;;  %v1014_v42 = vpop.f32.mrb[25].mxu1 }
 0x134   : > { %v1963_v38 = vpack.c.bf16 %v1276_v34, %v1276_v34  ;;  %v887_v43 = vpop.f32.mrb[26].mxu0  ;;  %v1015_v44 = vpop.f32.mrb[26].mxu1 }
 0x135   : > { %1565 = vst.msk [vmem:[%s2361_s25 + $0x2c] sm:$0xf] %vm1553_vm3, %v1931_v37  ;;  %v1181_v45 = vadd.f32 %v2347_v17, %v1110_v39  ;;  %v1213_v46 = vadd.f32 %v2347_v17, %v1142_v40  ;;  %v1111_v47 = vmul.f32 %v2342_v15, %v887_v43  ;;  %v1143_v48 = vmul.f32 %v2342_v15, %v1015_v44  ;;  %v889_v49 = vpop.f32.mrb[27].mxu0  ;;  %v1017_v50 = vpop.f32.mrb[27].mxu1 }
 0x136   : > { %1597 = vst.msk [vmem:[%s2361_s25 + $0xac] sm:$0xf] %vm1553_vm3, %v1963_v38 }
 0x137   : > { %v1245_v51 = vmax.f32 %v1181_v45, 0.0  ;;  %v1277_v52 = vmax.f32 %v1213_v46, 0.0  ;;  %v1182_v53 = vadd.f32 %v2347_v17, %v1111_v47  ;;  %v1214_v54 = vadd.f32 %v2347_v17, %v1143_v48 }
 0x139   : > { %v1932_v55 = vpack.c.bf16 %v1245_v51, %v1245_v51  ;;  %v1964_v56 = vpack.c.bf16 %v1277_v52, %v1277_v52  ;;  %v1246_v57 = vmax.f32 %v1182_v53, 0.0  ;;  %v1278_v58 = vmax.f32 %v1214_v54, 0.0 }
 0x13a   : > { %v892_v59 = vpop.f32.mrb[28].mxu0  ;;  %v1020_v60 = vpop.f32.mrb[28].mxu1 }
 0x13b   : > { %1566 = vst.msk [vmem:[%s2361_s25 + $0x30] sm:$0xf] %vm1553_vm3, %v1932_v55  ;;  %1598 = vst.msk [vmem:[%s2361_s25 + $0xb0] sm:$0xf] %vm1553_vm3, %v1964_v56  ;;  %v1933_v61 = vpack.c.bf16 %v1246_v57, %v1246_v57  ;;  %v1965_v62 = vpack.c.bf16 %v1278_v58, %v1278_v58  ;;  %v1112_v63 = vmul.f32 %v2342_v15, %v892_v59  ;;  %v894_v1 = vpop.f32.mrb[29].mxu0  ;;  %v1022_v2 = vpop.f32.mrb[29].mxu1 }
 0x13c   : > { %v1144_v0 = vmul.f32 %v2342_v15, %v1020_v60  ;;  %v895_v3 = vpop.f32.mrb[30].mxu0  ;;  %v1023_v4 = vpop.f32.mrb[30].mxu1 }
 0x13d   : > { %1567 = vst.msk [vmem:[%s2361_s25 + $0x34] sm:$0xf] %vm1553_vm3, %v1933_v61  ;;  %1599 = vst.msk [vmem:[%s2361_s25 + $0xb4] sm:$0xf] %vm1553_vm3, %v1965_v62  ;;  %v1183_v5 = vadd.f32 %v2347_v17, %v1112_v63  ;;  %v1113_v7 = vmul.f32 %v2342_v15, %v895_v3  ;;  %v1145_v8 = vmul.f32 %v2342_v15, %v1023_v4  ;;  %v897_v9 = vpop.f32.mrb[31].mxu0  ;;  %v1025_v10 = vpop.f32.mrb[31].mxu1 }
 0x13e   : > { %v1215_v6 = vadd.f32 %v2347_v17, %v1144_v0 }
 0x13f   : > { %v1247_v11 = vmax.f32 %v1183_v5, 0.0  ;;  %v1184_v13 = vadd.f32 %v2347_v17, %v1113_v7  ;;  %v1216_v14 = vadd.f32 %v2347_v17, %v1145_v8 }
 0x140   : > { %v1279_v12 = vmax.f32 %v1215_v6, 0.0 }
 0x141   : > { %v1934_v16 = vpack.c.bf16 %v1247_v11, %v1247_v11  ;;  %v1248_v19 = vmax.f32 %v1184_v13, 0.0  ;;  %v1280_v20 = vmax.f32 %v1216_v14, 0.0 }
 0x142   : > { %v1966_v18 = vpack.c.bf16 %v1279_v12, %v1279_v12  ;;  %v900_v21 = vpop.f32.mrb[32].mxu0  ;;  %v1028_v22 = vpop.f32.mrb[32].mxu1 }
 0x143   : > { %1568 = vst.msk [vmem:[%s2361_s25 + $0x38] sm:$0xf] %vm1553_vm3, %v1934_v16  ;;  %v1935_v23 = vpack.c.bf16 %v1248_v19, %v1248_v19  ;;  %v1967_v24 = vpack.c.bf16 %v1280_v20, %v1280_v20  ;;  %v1114_v25 = vmul.f32 %v2342_v15, %v900_v21  ;;  %v1146_v26 = vmul.f32 %v2342_v15, %v1028_v22  ;;  %v902_v27 = vpop.f32.mrb[33].mxu0  ;;  %v1030_v28 = vpop.f32.mrb[33].mxu1 }
 0x144   : > { %1600 = vst.msk [vmem:[%s2361_s25 + $0xb8] sm:$0xf] %vm1553_vm3, %v1966_v18  ;;  %v903_v29 = vpop.f32.mrb[34].mxu0  ;;  %v1031_v30 = vpop.f32.mrb[34].mxu1 }
 0x145   : > { %1569 = vst.msk [vmem:[%s2361_s25 + $0x3c] sm:$0xf] %vm1553_vm3, %v1935_v23  ;;  %1601 = vst.msk [vmem:[%s2361_s25 + $0xbc] sm:$0xf] %vm1553_vm3, %v1967_v24  ;;  %v1185_v31 = vadd.f32 %v2347_v17, %v1114_v25  ;;  %v1217_v32 = vadd.f32 %v2347_v17, %v1146_v26  ;;  %v1115_v33 = vmul.f32 %v2342_v15, %v903_v29  ;;  %v905_v35 = vpop.f32.mrb[35].mxu0  ;;  %v1033_v36 = vpop.f32.mrb[35].mxu1 }
 0x146   : > { %v1147_v34 = vmul.f32 %v2342_v15, %v1031_v30 }
 0x147   : > { %v1249_v37 = vmax.f32 %v1185_v31, 0.0  ;;  %v1281_v38 = vmax.f32 %v1217_v32, 0.0  ;;  %v1186_v39 = vadd.f32 %v2347_v17, %v1115_v33 }
 0x148   : > { %v1218_v40 = vadd.f32 %v2347_v17, %v1147_v34 }
 0x149   : > { %v1936_v41 = vpack.c.bf16 %v1249_v37, %v1249_v37  ;;  %v1968_v42 = vpack.c.bf16 %v1281_v38, %v1281_v38  ;;  %v1250_v43 = vmax.f32 %v1186_v39, 0.0 }
 0x14a   : > { %v1282_v44 = vmax.f32 %v1218_v40, 0.0  ;;  %v908_v45 = vpop.f32.mrb[36].mxu0  ;;  %v1036_v46 = vpop.f32.mrb[36].mxu1 }
 0x14b   : > { %1570 = vst.msk [vmem:[%s2361_s25 + $0x40] sm:$0xf] %vm1553_vm3, %v1936_v41  ;;  %1602 = vst.msk [vmem:[%s2361_s25 + $0xc0] sm:$0xf] %vm1553_vm3, %v1968_v42  ;;  %v1937_v47 = vpack.c.bf16 %v1250_v43, %v1250_v43  ;;  %v1116_v49 = vmul.f32 %v2342_v15, %v908_v45  ;;  %v1148_v50 = vmul.f32 %v2342_v15, %v1036_v46  ;;  %v910_v51 = vpop.f32.mrb[37].mxu0  ;;  %v1038_v52 = vpop.f32.mrb[37].mxu1 }
 0x14c   : > { %v1969_v48 = vpack.c.bf16 %v1282_v44, %v1282_v44  ;;  %v911_v53 = vpop.f32.mrb[38].mxu0  ;;  %v1039_v54 = vpop.f32.mrb[38].mxu1 }
 0x14d   : > { %1571 = vst.msk [vmem:[%s2361_s25 + $0x44] sm:$0xf] %vm1553_vm3, %v1937_v47  ;;  %v1187_v55 = vadd.f32 %v2347_v17, %v1116_v49  ;;  %v1219_v56 = vadd.f32 %v2347_v17, %v1148_v50  ;;  %v1117_v57 = vmul.f32 %v2342_v15, %v911_v53  ;;  %v1149_v58 = vmul.f32 %v2342_v15, %v1039_v54  ;;  %v913_v59 = vpop.f32.mrb[39].mxu0  ;;  %v1041_v60 = vpop.f32.mrb[39].mxu1 }
 0x14e   : > { %1603 = vst.msk [vmem:[%s2361_s25 + $0xc4] sm:$0xf] %vm1553_vm3, %v1969_v48 }
 0x14f   : > { %v1251_v61 = vmax.f32 %v1187_v55, 0.0  ;;  %v1283_v62 = vmax.f32 %v1219_v56, 0.0  ;;  %v1188_v63 = vadd.f32 %v2347_v17, %v1117_v57  ;;  %v1220_v0 = vadd.f32 %v2347_v17, %v1149_v58 }
 0x151   : > { %v1938_v1 = vpack.c.bf16 %v1251_v61, %v1251_v61  ;;  %v1970_v2 = vpack.c.bf16 %v1283_v62, %v1283_v62  ;;  %v1252_v3 = vmax.f32 %v1188_v63, 0.0  ;;  %v1284_v4 = vmax.f32 %v1220_v0, 0.0 }
 0x152   : > { %v916_v5 = vpop.f32.mrb[40].mxu0  ;;  %v1044_v6 = vpop.f32.mrb[40].mxu1 }
 0x153   : > { %1572 = vst.msk [vmem:[%s2361_s25 + $0x48] sm:$0xf] %vm1553_vm3, %v1938_v1  ;;  %1604 = vst.msk [vmem:[%s2361_s25 + $0xc8] sm:$0xf] %vm1553_vm3, %v1970_v2  ;;  %v1939_v7 = vpack.c.bf16 %v1252_v3, %v1252_v3  ;;  %v1971_v8 = vpack.c.bf16 %v1284_v4, %v1284_v4  ;;  %v1118_v9 = vmul.f32 %v2342_v15, %v916_v5  ;;  %v918_v11 = vpop.f32.mrb[41].mxu0  ;;  %v1046_v12 = vpop.f32.mrb[41].mxu1 }
 0x154   : > { %v1150_v10 = vmul.f32 %v2342_v15, %v1044_v6  ;;  %v919_v13 = vpop.f32.mrb[42].mxu0  ;;  %v1047_v14 = vpop.f32.mrb[42].mxu1 }
 0x155   : > { %1573 = vst.msk [vmem:[%s2361_s25 + $0x4c] sm:$0xf] %vm1553_vm3, %v1939_v7  ;;  %1605 = vst.msk [vmem:[%s2361_s25 + $0xcc] sm:$0xf] %vm1553_vm3, %v1971_v8  ;;  %v1189_v16 = vadd.f32 %v2347_v17, %v1118_v9  ;;  %v1119_v19 = vmul.f32 %v2342_v15, %v919_v13  ;;  %v1151_v20 = vmul.f32 %v2342_v15, %v1047_v14  ;;  %v921_v21 = vpop.f32.mrb[43].mxu0  ;;  %v1049_v22 = vpop.f32.mrb[43].mxu1 }
 0x156   : > { %v1221_v18 = vadd.f32 %v2347_v17, %v1150_v10 }
 0x157   : > { %v1253_v23 = vmax.f32 %v1189_v16, 0.0  ;;  %v1190_v25 = vadd.f32 %v2347_v17, %v1119_v19  ;;  %v1222_v26 = vadd.f32 %v2347_v17, %v1151_v20 }
 0x158   : > { %v1285_v24 = vmax.f32 %v1221_v18, 0.0 }
 0x159   : > { %v1940_v27 = vpack.c.bf16 %v1253_v23, %v1253_v23  ;;  %v1254_v29 = vmax.f32 %v1190_v25, 0.0  ;;  %v1286_v30 = vmax.f32 %v1222_v26, 0.0 }
 0x15a   : > { %v1972_v28 = vpack.c.bf16 %v1285_v24, %v1285_v24  ;;  %v924_v31 = vpop.f32.mrb[44].mxu0  ;;  %v1052_v32 = vpop.f32.mrb[44].mxu1 }
 0x15b   : > { %1574 = vst.msk [vmem:[%s2361_s25 + $0x50] sm:$0xf] %vm1553_vm3, %v1940_v27  ;;  %v1941_v33 = vpack.c.bf16 %v1254_v29, %v1254_v29  ;;  %v1973_v34 = vpack.c.bf16 %v1286_v30, %v1286_v30  ;;  %v1120_v35 = vmul.f32 %v2342_v15, %v924_v31  ;;  %v1152_v36 = vmul.f32 %v2342_v15, %v1052_v32  ;;  %v926_v37 = vpop.f32.mrb[45].mxu0  ;;  %v1054_v38 = vpop.f32.mrb[45].mxu1 }
 0x15c   : > { %1606 = vst.msk [vmem:[%s2361_s25 + $0xd0] sm:$0xf] %vm1553_vm3, %v1972_v28  ;;  %v927_v39 = vpop.f32.mrb[46].mxu0  ;;  %v1055_v40 = vpop.f32.mrb[46].mxu1 }
 0x15d   : > { %1575 = vst.msk [vmem:[%s2361_s25 + $0x54] sm:$0xf] %vm1553_vm3, %v1941_v33  ;;  %1607 = vst.msk [vmem:[%s2361_s25 + $0xd4] sm:$0xf] %vm1553_vm3, %v1973_v34  ;;  %v1191_v41 = vadd.f32 %v2347_v17, %v1120_v35  ;;  %v1223_v42 = vadd.f32 %v2347_v17, %v1152_v36  ;;  %v1121_v43 = vmul.f32 %v2342_v15, %v927_v39  ;;  %v929_v45 = vpop.f32.mrb[47].mxu0  ;;  %v1057_v46 = vpop.f32.mrb[47].mxu1 }
 0x15e   : > { %v1153_v44 = vmul.f32 %v2342_v15, %v1055_v40 }
 0x15f   : > { %v1255_v47 = vmax.f32 %v1191_v41, 0.0  ;;  %v1287_v48 = vmax.f32 %v1223_v42, 0.0  ;;  %v1192_v49 = vadd.f32 %v2347_v17, %v1121_v43 }
 0x160   : > { %v1224_v50 = vadd.f32 %v2347_v17, %v1153_v44 }
 0x161   : > { %v1942_v51 = vpack.c.bf16 %v1255_v47, %v1255_v47  ;;  %v1974_v52 = vpack.c.bf16 %v1287_v48, %v1287_v48  ;;  %v1256_v53 = vmax.f32 %v1192_v49, 0.0 }
 0x162   : > { %v1288_v54 = vmax.f32 %v1224_v50, 0.0  ;;  %v932_v55 = vpop.f32.mrb[48].mxu0  ;;  %v1060_v56 = vpop.f32.mrb[48].mxu1 }
 0x163   : > { %1576 = vst.msk [vmem:[%s2361_s25 + $0x58] sm:$0xf] %vm1553_vm3, %v1942_v51  ;;  %1608 = vst.msk [vmem:[%s2361_s25 + $0xd8] sm:$0xf] %vm1553_vm3, %v1974_v52  ;;  %v1943_v57 = vpack.c.bf16 %v1256_v53, %v1256_v53  ;;  %v1122_v59 = vmul.f32 %v2342_v15, %v932_v55  ;;  %v1154_v60 = vmul.f32 %v2342_v15, %v1060_v56  ;;  %v934_v61 = vpop.f32.mrb[49].mxu0  ;;  %v1062_v62 = vpop.f32.mrb[49].mxu1 }
 0x164   : > { %v1975_v58 = vpack.c.bf16 %v1288_v54, %v1288_v54  ;;  %v935_v63 = vpop.f32.mrb[50].mxu0  ;;  %v1063_v0 = vpop.f32.mrb[50].mxu1 }
 0x165   : > { %1577 = vst.msk [vmem:[%s2361_s25 + $0x5c] sm:$0xf] %vm1553_vm3, %v1943_v57  ;;  %v1193_v1 = vadd.f32 %v2347_v17, %v1122_v59  ;;  %v1225_v2 = vadd.f32 %v2347_v17, %v1154_v60  ;;  %v1123_v3 = vmul.f32 %v2342_v15, %v935_v63  ;;  %v1155_v4 = vmul.f32 %v2342_v15, %v1063_v0  ;;  %v937_v5 = vpop.f32.mrb[51].mxu0  ;;  %v1065_v6 = vpop.f32.mrb[51].mxu1 }
 0x166   : > { %1609 = vst.msk [vmem:[%s2361_s25 + $0xdc] sm:$0xf] %vm1553_vm3, %v1975_v58 }
 0x167   : > { %v1257_v7 = vmax.f32 %v1193_v1, 0.0  ;;  %v1289_v8 = vmax.f32 %v1225_v2, 0.0  ;;  %v1194_v9 = vadd.f32 %v2347_v17, %v1123_v3  ;;  %v1226_v10 = vadd.f32 %v2347_v17, %v1155_v4 }
 0x169   : > { %v1944_v11 = vpack.c.bf16 %v1257_v7, %v1257_v7  ;;  %v1976_v12 = vpack.c.bf16 %v1289_v8, %v1289_v8  ;;  %v1258_v13 = vmax.f32 %v1194_v9, 0.0  ;;  %v1290_v14 = vmax.f32 %v1226_v10, 0.0 }
 0x16a   : > { %v940_v16 = vpop.f32.mrb[52].mxu0  ;;  %v1068_v18 = vpop.f32.mrb[52].mxu1 }
 0x16b   : > { %1578 = vst.msk [vmem:[%s2361_s25 + $0x60] sm:$0xf] %vm1553_vm3, %v1944_v11  ;;  %1610 = vst.msk [vmem:[%s2361_s25 + $0xe0] sm:$0xf] %vm1553_vm3, %v1976_v12  ;;  %v1945_v19 = vpack.c.bf16 %v1258_v13, %v1258_v13  ;;  %v1977_v20 = vpack.c.bf16 %v1290_v14, %v1290_v14  ;;  %v1124_v21 = vmul.f32 %v2342_v15, %v940_v16  ;;  %v942_v23 = vpop.f32.mrb[53].mxu0  ;;  %v1070_v24 = vpop.f32.mrb[53].mxu1 }
 0x16c   : > { %v1156_v22 = vmul.f32 %v2342_v15, %v1068_v18  ;;  %v943_v25 = vpop.f32.mrb[54].mxu0  ;;  %v1071_v26 = vpop.f32.mrb[54].mxu1 }
 0x16d   : > { %1579 = vst.msk [vmem:[%s2361_s25 + $0x64] sm:$0xf] %vm1553_vm3, %v1945_v19  ;;  %1611 = vst.msk [vmem:[%s2361_s25 + $0xe4] sm:$0xf] %vm1553_vm3, %v1977_v20  ;;  %v1195_v27 = vadd.f32 %v2347_v17, %v1124_v21  ;;  %v1125_v29 = vmul.f32 %v2342_v15, %v943_v25  ;;  %v1157_v30 = vmul.f32 %v2342_v15, %v1071_v26  ;;  %v945_v31 = vpop.f32.mrb[55].mxu0  ;;  %v1073_v32 = vpop.f32.mrb[55].mxu1 }
 0x16e   : > { %v1227_v28 = vadd.f32 %v2347_v17, %v1156_v22 }
 0x16f   : > { %v1259_v33 = vmax.f32 %v1195_v27, 0.0  ;;  %v1196_v35 = vadd.f32 %v2347_v17, %v1125_v29  ;;  %v1228_v36 = vadd.f32 %v2347_v17, %v1157_v30 }
 0x170   : > { %v1291_v34 = vmax.f32 %v1227_v28, 0.0 }
 0x171   : > { %v1946_v37 = vpack.c.bf16 %v1259_v33, %v1259_v33  ;;  %v1260_v39 = vmax.f32 %v1196_v35, 0.0  ;;  %v1292_v40 = vmax.f32 %v1228_v36, 0.0 }
 0x172   : > { %v1978_v38 = vpack.c.bf16 %v1291_v34, %v1291_v34  ;;  %v948_v41 = vpop.f32.mrb[56].mxu0  ;;  %v1076_v42 = vpop.f32.mrb[56].mxu1 }
 0x173   : > { %1580 = vst.msk [vmem:[%s2361_s25 + $0x68] sm:$0xf] %vm1553_vm3, %v1946_v37  ;;  %v1947_v43 = vpack.c.bf16 %v1260_v39, %v1260_v39  ;;  %v1979_v44 = vpack.c.bf16 %v1292_v40, %v1292_v40  ;;  %v1126_v45 = vmul.f32 %v2342_v15, %v948_v41  ;;  %v1158_v46 = vmul.f32 %v2342_v15, %v1076_v42  ;;  %v950_v47 = vpop.f32.mrb[57].mxu0  ;;  %v1078_v48 = vpop.f32.mrb[57].mxu1 }
 0x174   : > { %1612 = vst.msk [vmem:[%s2361_s25 + $0xe8] sm:$0xf] %vm1553_vm3, %v1978_v38  ;;  %v951_v49 = vpop.f32.mrb[58].mxu0  ;;  %v1079_v50 = vpop.f32.mrb[58].mxu1 }
 0x175   : > { %1581 = vst.msk [vmem:[%s2361_s25 + $0x6c] sm:$0xf] %vm1553_vm3, %v1947_v43  ;;  %1613 = vst.msk [vmem:[%s2361_s25 + $0xec] sm:$0xf] %vm1553_vm3, %v1979_v44  ;;  %v1197_v51 = vadd.f32 %v2347_v17, %v1126_v45  ;;  %v1229_v52 = vadd.f32 %v2347_v17, %v1158_v46  ;;  %v1127_v53 = vmul.f32 %v2342_v15, %v951_v49  ;;  %v953_v55 = vpop.f32.mrb[59].mxu0  ;;  %v1081_v56 = vpop.f32.mrb[59].mxu1 }
 0x176   : > { %v1159_v54 = vmul.f32 %v2342_v15, %v1079_v50 }
 0x177   : > { %v1261_v57 = vmax.f32 %v1197_v51, 0.0  ;;  %v1293_v58 = vmax.f32 %v1229_v52, 0.0  ;;  %v1198_v59 = vadd.f32 %v2347_v17, %v1127_v53 }
 0x178   : > { %v1230_v60 = vadd.f32 %v2347_v17, %v1159_v54 }
 0x179   : > { %v1948_v61 = vpack.c.bf16 %v1261_v57, %v1261_v57  ;;  %v1980_v62 = vpack.c.bf16 %v1293_v58, %v1293_v58  ;;  %v1262_v63 = vmax.f32 %v1198_v59, 0.0 }
 0x17a   : > { %v1294_v0 = vmax.f32 %v1230_v60, 0.0  ;;  %v956_v1 = vpop.f32.mrb[60].mxu0  ;;  %v1084_v2 = vpop.f32.mrb[60].mxu1 }
 0x17b   : > { %1582 = vst.msk [vmem:[%s2361_s25 + $0x70] sm:$0xf] %vm1553_vm3, %v1948_v61  ;;  %1614 = vst.msk [vmem:[%s2361_s25 + $0xf0] sm:$0xf] %vm1553_vm3, %v1980_v62  ;;  %v1949_v3 = vpack.c.bf16 %v1262_v63, %v1262_v63  ;;  %v1128_v5 = vmul.f32 %v2342_v15, %v956_v1  ;;  %v1160_v6 = vmul.f32 %v2342_v15, %v1084_v2  ;;  %v958_v7 = vpop.f32.mrb[61].mxu0  ;;  %v1086_v8 = vpop.f32.mrb[61].mxu1 }
 0x17c   : > { %v1981_v4 = vpack.c.bf16 %v1294_v0, %v1294_v0  ;;  %v959_v9 = vpop.f32.mrb[62].mxu0  ;;  %v1087_v10 = vpop.f32.mrb[62].mxu1 }
 0x17d   : > { %1583 = vst.msk [vmem:[%s2361_s25 + $0x74] sm:$0xf] %vm1553_vm3, %v1949_v3  ;;  %v1199_v11 = vadd.f32 %v2347_v17, %v1128_v5  ;;  %v1231_v12 = vadd.f32 %v2347_v17, %v1160_v6  ;;  %v1129_v13 = vmul.f32 %v2342_v15, %v959_v9  ;;  %v1161_v14 = vmul.f32 %v2342_v15, %v1087_v10  ;;  %v961_v16 = vpop.f32.mrb[63].mxu0  ;;  %v1089_v18 = vpop.f32.mrb[63].mxu1 }
 0x17e   : > { %1615 = vst.msk [vmem:[%s2361_s25 + $0xf4] sm:$0xf] %vm1553_vm3, %v1981_v4 }
 0x17f   : > { %v1263_v19 = vmax.f32 %v1199_v11, 0.0  ;;  %v1295_v20 = vmax.f32 %v1231_v12, 0.0  ;;  %v1200_v21 = vadd.f32 %v2347_v17, %v1129_v13  ;;  %v1232_v22 = vadd.f32 %v2347_v17, %v1161_v14 }
 0x181   : > { %v1950_v23 = vpack.c.bf16 %v1263_v19, %v1263_v19  ;;  %v1982_v24 = vpack.c.bf16 %v1295_v20, %v1295_v20  ;;  %v1264_v25 = vmax.f32 %v1200_v21, 0.0  ;;  %v1296_v26 = vmax.f32 %v1232_v22, 0.0 }
 0x183   : > { %1584 = vst.msk [vmem:[%s2361_s25 + $0x78] sm:$0xf] %vm1553_vm3, %v1950_v23  ;;  %1616 = vst.msk [vmem:[%s2361_s25 + $0xf8] sm:$0xf] %vm1553_vm3, %v1982_v24  ;;  %v1951_v27 = vpack.c.bf16 %v1264_v25, %v1264_v25  ;;  %v1983_v28 = vpack.c.bf16 %v1296_v26, %v1296_v26 }
 0x185   : > { %1585 = vst.msk [vmem:[%s2361_s25 + $0x7c] sm:$0xf] %vm1553_vm3, %v1951_v27  ;;  %1617 = vst.msk [vmem:[%s2361_s25 + $0xfc] sm:$0xf] %vm1553_vm3, %v1983_v28 }
 0x186 PF: > { %s14_s17 = sadd.s32 1, %s2158_s17   ;;  %s2625_s15 = smov %s2154_s16 }
 0x187   : > { %p11_p5 = scmp.ge.s32.totalorder %s14_s17, 6   ;;  %s2626_s16 = smov %s2628_s18 }
 0x189   :  { %13 = sbr.rel (!%p11_p5) target bundleno = 2 (0x2), region = 75 }

</bundles_post_ra>
